<compile_context>
chip_gen: v7x
topology: tpu7x:2x2x1
jax: 0.10.0
libtpu: 0.0.40
codegen_flags: <defaults>
</compile_context>

<pallas_src>
import jax
import jax.numpy as jnp
from jax.experimental import pallas as pl
from jax.experimental.pallas import tpu as pltpu


def _round_up(x, m):
    return (x + m - 1) // m * m


def _vmem_capacity_bytes():
    # Per-TensorCore physical VMEM: 128 MiB (v5e/v6e), 64 MiB (v7x).
    try:
        return int(pltpu.get_tpu_info().vmem_capacity_bytes)
    except Exception:
        return 64 << 20  # conservative fallback (v7x per-core capacity)


def _logreg_kernel(x_ref, w_ref, o_ref):
    # x_ref: (tile_n, D) f32   w_ref: (1, D) f32 (resident)   o_ref: (tile_n, 1) f32
    x = x_ref[...]
    w = w_ref[...]
    # Row-wise dot product: VPU multiply + XLU cross-lane reduce (no MXU).
    z = jnp.sum(x * w, axis=-1, keepdims=True)              # (tile_n, 1) f32
    # Exact, numerically-stable sigmoid: one EUP exp on |z|, no overflow, and
    # negligible cost next to streaming tile_n * D floats from HBM.
    e = jnp.exp(-jnp.abs(z))
    o_ref[...] = jnp.where(z >= 0, 1.0 / (1.0 + e), e / (1.0 + e))


def logreg_forward(x, w, *, tile_n=None):
    """x: (N, D) float32, w: (1, D) float32 (torch Linear weight) -> (N,) float32."""
    N, D = x.shape
    assert w.shape == (1, D), w.shape

    vmem_cap = _vmem_capacity_bytes()
    d_lanes = _round_up(D, 128)             # f32 lane-padded feature width in VMEM
    per_row_bytes = 4 * (d_lanes + 128)     # x-tile row + lane-padded output row

    if tile_n is None:
        # Total double-buffered working-set budget: half of physical VMEM,
        # capped at 64 MiB -> ~16 MiB x tiles per buffer on v5e/v6e,
        # ~8 MiB on v7x (safely inside its 64 MiB per-core VMEM).
        ws_budget = min(vmem_cap // 2, 64 << 20)
        rows_for_budget = max(8, (ws_budget // (2 * per_row_bytes)) // 8 * 8)
        # Keep >= ~8 grid steps so v7x's two TensorCores get work and the
        # input pipeline has iterations to overlap (no-op for small N).
        rows_for_steps = max(8, _round_up(pl.cdiv(N, 8), 8))
        tile_n = min(rows_for_budget, rows_for_steps)
    tile_n = max(8, _round_up(tile_n, 8))

    # TODO(synk): for very large D, add a second "arbitrary" grid axis over the
    # feature dimension with a VMEM f32 accumulator (pl.when init/finalize) so
    # the per-step footprint is bounded independent of D.
    # TODO(synk): for D < 128, fold k = 128 // D rows into the lane dimension
    # (reshape x to (N/k, k*D), tile w k times, segmented reduce) to restore
    # full lane occupancy; skipped here in favor of guaranteed-clean lowering.

    grid = (pl.cdiv(N, tile_n),)

    # Explicit VMEM budget, accounting for lane padding:
    #   2x double-buffered x tile + sublane/lane-padded weight row +
    #   2x lane-padded (tile_n, 1) output column + headroom.
    x_bytes = 2 * tile_n * d_lanes * 4
    w_bytes = 2 * 8 * d_lanes * 4
    o_bytes = 2 * tile_n * 128 * 4
    vmem_limit = x_bytes + w_bytes + o_bytes + (2 << 20)
    vmem_limit = int(min(max(vmem_limit, 16 << 20), vmem_cap))

    out = pl.pallas_call(
        _logreg_kernel,
        out_shape=jax.ShapeDtypeStruct((N, 1), jnp.float32),
        grid=grid,
        in_specs=[
            pl.BlockSpec((tile_n, D), lambda i: (i, 0)),   # stream x row tiles
            pl.BlockSpec((1, D), lambda i: (0, 0)),        # weight stays resident
        ],
        out_specs=pl.BlockSpec((tile_n, 1), lambda i: (i, 0)),
        compiler_params=pltpu.CompilerParams(
            dimension_semantics=("parallel",),
            vmem_limit_bytes=vmem_limit,
        ),
    )(x, w)

    # PyTorch forward returns y_pred[:, 0].
    return out[:, 0]


if __name__ == "__main__":
    # Small shapes consistent with the module: batch N=8, features D=32.
    N, D = 8, 32
    key = jax.random.PRNGKey(0)
    kx, kw = jax.random.split(key)

    x = jax.random.normal(kx, (N, D), dtype=jnp.float32)

    # torch.nn.Linear(D, 1, bias=False) default init: U(-1/sqrt(D), 1/sqrt(D));
    # weight kept in the native torch layout (out_features=1, in_features=D).
    bound = 1.0 / (D ** 0.5)
    w = jax.random.uniform(kw, (1, D), dtype=jnp.float32, minval=-bound, maxval=bound)

    y_pred = logreg_forward(x, w)
    jax.block_until_ready(y_pred)

    # Pure-JAX reference (exact sigmoid of the linear layer).
    y_ref = jax.nn.sigmoid(jnp.sum(x * w[0], axis=-1))
    assert y_pred.shape == (N,)
    assert jnp.allclose(y_pred, y_ref, atol=1e-5, rtol=1e-5), (
        float(jnp.max(jnp.abs(y_pred - y_ref)))
    )

    print("KERNEL_OK")
</pallas_src>

<mosaic_0001>
module attributes {stable_mosaic.version = 11 : i64} {
  func.func @_logreg_kernel(%arg0: i32, %arg1: memref<8x32xf32, #tpu.memory_space<vmem>>, %arg2: memref<1x32xf32, #tpu.memory_space<vmem>>, %arg3: memref<8x1xf32, #tpu.memory_space<vmem>>) attributes {dimension_semantics = [#tpu.dimension_semantics<parallel>], iteration_bounds = array<i64: 1>, scalar_prefetch = 0 : i64, scratch_operands = 0 : i64, tpu.core_type = #tpu.core_type<tc>, window_params = [{transform_indices = @transform_0, window_bounds = array<i64: 8, 32>}, {pipeline_mode = #tpu.pipeline_mode<synchronous>, transform_indices = @transform_1, window_bounds = array<i64: 1, 32>}, {transform_indices = @transform_2, window_bounds = array<i64: 8, 1>}]} {
    %c0 = arith.constant 0 : index
    %c0_0 = arith.constant 0 : index
    %0 = vector.load %arg1[%c0, %c0_0] : memref<8x32xf32, #tpu.memory_space<vmem>>, vector<8x32xf32>
    %c0_1 = arith.constant 0 : index
    %c0_2 = arith.constant 0 : index
    %1 = vector.load %arg2[%c0_1, %c0_2] : memref<1x32xf32, #tpu.memory_space<vmem>>, vector<1x32xf32>
    %2 = vector.broadcast %1 : vector<1x32xf32> to vector<8x32xf32>
    %3 = arith.mulf %0, %2 : vector<8x32xf32>
    %cst = arith.constant dense<0.000000e+00> : vector<8xf32>
    %4 = vector.multi_reduction <add>, %3, %cst [1] : vector<8x32xf32> to vector<8xf32>
    %5 = vector.shape_cast %4 : vector<8xf32> to vector<8x1xf32>
    %6 = math.absf %5 : vector<8x1xf32>
    %cst_3 = arith.constant 0.000000e+00 : f32
    %7 = vector.broadcast %cst_3 : f32 to vector<8x1xf32>
    %8 = arith.subf %7, %6 : vector<8x1xf32>
    %9 = math.exp %8 : vector<8x1xf32>
    %cst_4 = arith.constant 0.000000e+00 : f32
    %10 = vector.broadcast %cst_4 : f32 to vector<8x1xf32>
    %11 = arith.cmpf oge, %5, %10 : vector<8x1xf32>
    %cst_5 = arith.constant 1.000000e+00 : f32
    %12 = vector.broadcast %cst_5 : f32 to vector<8x1xf32>
    %13 = arith.addf %12, %9 : vector<8x1xf32>
    %cst_6 = arith.constant 1.000000e+00 : f32
    %14 = vector.broadcast %cst_6 : f32 to vector<8x1xf32>
    %15 = arith.divf %14, %13 : vector<8x1xf32>
    %cst_7 = arith.constant 1.000000e+00 : f32
    %16 = vector.broadcast %cst_7 : f32 to vector<8x1xf32>
    %17 = arith.addf %16, %9 : vector<8x1xf32>
    %18 = arith.divf %9, %17 : vector<8x1xf32>
    %19 = arith.select %11, %15, %18 : vector<8x1xi1>, vector<8x1xf32>
    %c0_8 = arith.constant 0 : index
    %c0_9 = arith.constant 0 : index
    %20 = vector.load %arg3[%c0_8, %c0_9] : memref<8x1xf32, #tpu.memory_space<vmem>>, vector<8x1xf32>
    tpu.vector_store %arg3[%c0_8, %c0_9], %19 {strides = array<i32>} : memref<8x1xf32, #tpu.memory_space<vmem>>, vector<8x1xf32>,
    return
  }
  func.func @transform_0(%arg0: i32) -> (i32, i32) {
    %c0_i32 = arith.constant 0 : i32
    %c0_i32_0 = arith.constant 0 : i32
    return %arg0, %c0_i32 : i32, i32
  }
  func.func @transform_1(%arg0: i32) -> (i32, i32) {
    %c0_i32 = arith.constant 0 : i32
    %c0_i32_0 = arith.constant 0 : i32
    %c0_i32_1 = arith.constant 0 : i32
    return %c0_i32, %c0_i32_0 : i32, i32
  }
  func.func @transform_2(%arg0: i32) -> (i32, i32) {
    %c0_i32 = arith.constant 0 : i32
    %c0_i32_0 = arith.constant 0 : i32
    return %arg0, %c0_i32 : i32, i32
  }
}

</mosaic_0001>

<bundles_post_ra>
// kernel: tpu_custom_call.1
= control target key start
LH: loop header
LB: loop body
LE: loop exit
PB: predicated region body
PF: predicated region fallthrough
CT: control target
= control target key end

     0   :  { %7 = vsyncpa [#allocation3], 0  ;;  %s83_s9 = smov [#allocation2]   ;;  %s117_s0 = inlined_call_operand.hbm [shape: f32[8,32], index: 0, kind: input, shape index: {}]   ;;  %s118_s1 = inlined_call_operand.vmem [shape: f32[1,32], index: 1, kind: input, shape index: {}]   ;;  %s119_s2 = inlined_call_operand.vmem [shape: f32[8,1], index: 2, kind: output, shape index: {}]  }
   0x1   :  { %s14_s10 = sshll.u32 %s83_s9, 4  ;;  %s59_s13 = scalar_lea.hbm %s117_s0, 128  ;;  %s15_s10 = int_to_ptr.vmem [resolvable:$true] %s14_s10 }
   0x2   :  { %p60_p0 = scmp.ne.s32.totalorder %s117_s0, %s59_s13  ;;  %p63_p1 = scmp.lt.u32.totalorder %s59_s13, %s117_s0 }
   0x4   :  { %p65_p2 = pnand %p63_p1, %p60_p0 }
   0x6   :  { %68 = shalt.err (!%p65_p2)
}
   0x7   :  { %s69_s18 = scalar_lea.vmem %s15_s10, 128  ;;  %p74_p4 = scmp.lt.s32.totalorder %s15_s10, %s15_s10 }
   0x8   :  { %p70_p3 = scmp.ne.s32.totalorder %s15_s10, %s69_s18  ;;  %p75_p5 = scmp.lt.s32.totalorder %s69_s18, %s69_s18 }
   0xa   :  { %p76_p6 = por %p75_p5, %p74_p4 }
   0xc   :  { %p77_p7 = pnand %p76_p6, %p70_p3 }
   0xe   :  { %80 = shalt.err (!%p77_p7)
}
   0xf   :  { %17 = dma.hbm_to_vmem [thread:$0]  %s117_s0, 128, %s15_s10, [#allocation3]  }
  0x10   :  { %81 = dma.done.wait [#allocation3], 128  }
  0x11   :  { %82 = vsyncadd [#allocation3], 4294967168  ;;  %v23_v0 = vld [vmem:[#allocation2] sm:$0xff]  ;;  %vm32_vm0 = vcmask 261120   ;;  %vm46_vm1 = vcmask 7168  }
  0x12   :  { %v53_v1 = vld [vmem:[%s118_s1] ss:$0 sm:$0xff] }
  0x13   :  { %v31_v2 = vmul.f32 %v53_v1, %v23_v0 }
  0x15   :  { %v33_v3 = vsel %vm32_vm0, %v31_v2, 0.0 }
  0x16   :  { %34 = vadd.xlane.f32.xlu0 %v33_v3 }
  0xa3   :  { %v35_v4 = vpop.xlane.xlu0 %34 }
  0xa4   :  { %v36_v5 = vand.u32 2147483647, %v35_v4  ;;  %vm40_vm2 = vcmp.ge.f32.partialorder %v35_v4, 0.0 }
  0xa6   :  { %v37_v6 = vsub.f32 0.0, %v36_v5 }
  0xa8   :  { %v38_v7 = vmul.f32 1.442695, %v37_v6 }
  0xaa   :  { %55 = vpow2.f32 %v38_v7 }
  0xb4   :  { %v56_v8 = vpop.eup %55 }
  0xb5   :  { %v41_v9 = vadd.f32 1.0, %v56_v8 }
  0xb7   :  { %57 = vrcp.f32 %v41_v9 }
  0xc1   :  { %v58_v10 = vpop.eup %57 }
  0xc2   :  { %v44_v11 = vmul.f32 %v58_v10, %v56_v8 }
  0xc4   :  { %v45_v12 = vsel %vm40_vm2, %v58_v10, %v44_v11 }
  0xc5   :  { %47 = vst.msk [vmem:[%s119_s2] sm:$0xff] %vm46_vm1, %v45_v12 }
  0xc6   :  { %52 = vsyncpa [#allocation3], 1 }

</bundles_post_ra>
